<compile_context>
chip_gen: v6e
topology: v6e:2x2x1
jax: 0.10.0
libtpu: 0.0.40
codegen_flags: <defaults>
</compile_context>

<pallas_src>
import functools
import math

import jax
import jax.numpy as jnp
from jax.experimental import pallas as pl
from jax.experimental.pallas import tpu as pltpu


def _lp_rms_norm_kernel(x_ref, w_ref, o_ref, *, eps, inv_h):
    # x_ref: (tm, H) tile of the flattened input
    # w_ref: (1, H)  weight vector in the input dtype (cast hoisted to wrapper)
    x = x_ref[...]
    xf = x.astype(jnp.float32)
    # Sum of squares in f32 (cross-lane reduce goes to XLU, not VALU); fold
    # 1/H into the rsqrt argument so there is a single EUP op per row.
    ssq = jnp.sum(xf * xf, axis=-1, keepdims=True)
    inv = jax.lax.rsqrt(ssq * inv_h + eps)            # EUP rsqrt
    # Final scaling in the input dtype (matches the eager low-precision path
    # and halves full-tile f32 temporaries).
    y = x * inv.astype(x.dtype) * w_ref[...]
    o_ref[...] = y.astype(o_ref.dtype)


def _vmem_budget_and_limit():
    """Generation-aware tile-data budget and scoped-VMEM limit cap (bytes)."""
    try:
        cap = int(pltpu.get_tpu_info().vmem_capacity_bytes)
    except Exception:
        cap = 64 << 20                      # conservative: v7x per-TC VMEM
    if cap >= (100 << 20):                  # v5e / v6e: 128 MiB VMEM
        return 92 << 20, 112 << 20
    return 46 << 20, 56 << 20               # v7x: 64 MiB, leave compiler headroom


def _choose_block_rows(rows, H, itemsize, budget):
    """Largest VMEM-budgeted row tile, preferring >= 4 grid steps."""
    sub = max(8, 32 // itemsize)            # sublane packing multiple
    # Per-row VMEM cost: 2x input + 2x output double buffers (x dtype) plus
    # ~2 rows worth of f32 temporaries inside the kernel.
    per_row = H * (4 * itemsize + 8)
    br = (budget // per_row) // sub * sub
    br = max(sub, br)
    # Target >= 4 grid steps when rows permit: keeps the software pipeline
    # full (hides head/tail DMA exposure) and gives each v7x TensorCore at
    # least 2 steps under dimension_semantics=("parallel",).
    target_steps = 4
    if rows > target_steps * sub:
        per_step = -(-rows // target_steps)          # ceil
        per_step = -(-per_step // sub) * sub         # round up to sublane mult
        br = min(br, per_step)
    # Never exceed the (sublane-rounded) total row count.
    br = min(br, -(-rows // sub) * sub)
    return int(max(sub, br))


def lp_rms_norm(x, weight, eps=1e-5, *, block_rows=None):
    """LPRMSNorm forward. x: (..., H); weight: (H,) or None."""
    orig_shape = x.shape
    orig_dtype = x.dtype
    H = orig_shape[-1]
    rows = math.prod(orig_shape[:-1]) if len(orig_shape) > 1 else 1
    x2d = x.reshape(rows, H)

    itemsize = jnp.dtype(orig_dtype).itemsize
    budget, limit_cap = _vmem_budget_and_limit()
    if block_rows is None:
        block_rows = _choose_block_rows(rows, H, itemsize, budget)
    # TODO(synk): if even the minimum tile (8 x H) blows the VMEM budget
    # (extreme H), an in-kernel H split / two-pass reduction would be needed.

    # Weight: cast once in the wrapper (hoisted out of the kernel hot loop).
    if weight is None:
        weight = jnp.ones((H,), dtype=orig_dtype)
    w2d = weight.astype(orig_dtype).reshape(1, H)

    # Ragged rows: rely on Pallas partial-last-block masking (no padding copy).
    num_blocks = pl.cdiv(rows, block_rows)
    grid = (num_blocks,)

    # Explicit scoped-VMEM limit: in/out double buffers + weight + f32 temps.
    tile_bytes = block_rows * H * itemsize
    f32_tile_bytes = block_rows * H * 4
    vmem_need = 4 * tile_bytes + 2 * f32_tile_bytes + 4 * H * itemsize + (2 << 20)
    vmem_limit = int(min(max(vmem_need, 16 << 20), limit_cap))

    out = pl.pallas_call(
        functools.partial(_lp_rms_norm_kernel, eps=eps, inv_h=1.0 / H),
        out_shape=jax.ShapeDtypeStruct((rows, H), orig_dtype),
        grid_spec=pltpu.PrefetchScalarGridSpec(
            num_scalar_prefetch=0,
            grid=grid,
            in_specs=[
                pl.BlockSpec((block_rows, H), lambda i: (i, 0)),
                pl.BlockSpec((1, H), lambda i: (0, 0)),
            ],
            out_specs=pl.BlockSpec((block_rows, H), lambda i: (i, 0)),
        ),
        compiler_params=pltpu.CompilerParams(
            dimension_semantics=("parallel",),
            vmem_limit_bytes=vmem_limit,
        ),
    )(x2d, w2d)

    return out.reshape(orig_shape)


def _reference(x, weight, eps):
    xf = x.astype(jnp.float32)
    ref = xf * jax.lax.rsqrt(jnp.mean(xf * xf, axis=-1, keepdims=True) + eps)
    if weight is not None:
        ref = ref * weight.astype(jnp.float32)
    return ref.astype(x.dtype)


if __name__ == "__main__":
    eps = 1e-5
    key = jax.random.PRNGKey(0)
    k0, k1, k2, k3 = jax.random.split(key, 4)

    # 1) Module-consistent toy shape: normalized_shape = hidden = 32,
    #    x: (batch=2, seq=8, hidden=32), f32.
    batch, seq, hidden = 2, 8, 32
    x = jax.random.normal(k0, (batch, seq, hidden), dtype=jnp.float32)
    weight = jnp.ones((hidden,), dtype=jnp.float32)
    y = jax.block_until_ready(lp_rms_norm(x, weight, eps))
    ref = _reference(x, weight, eps)
    assert jnp.allclose(y, ref, atol=1e-5, rtol=1e-5), "f32 mismatch vs reference"

    # 2) bf16, lane-dense hidden (multiple of 128).
    x_bf = jax.random.normal(k1, (4, 16, 256), dtype=jnp.bfloat16)
    w_bf = (1.0 + 0.1 * jax.random.normal(k2, (256,), dtype=jnp.float32)).astype(
        jnp.bfloat16
    )
    y_bf = jax.block_until_ready(lp_rms_norm(x_bf, w_bf, eps))
    ref_bf = _reference(x_bf, w_bf, eps)
    assert jnp.allclose(
        y_bf.astype(jnp.float32), ref_bf.astype(jnp.float32), atol=3e-2, rtol=3e-2
    ), "bf16 mismatch vs reference"

    # 3) Ragged rows (rows % block != 0), weight=None — single partial block.
    x_rag = jax.random.normal(k1, (5, 4, 32), dtype=jnp.float32)
    y_rag = jax.block_until_ready(lp_rms_norm(x_rag, None, eps))
    ref_rag = _reference(x_rag, None, eps)
    assert jnp.allclose(y_rag, ref_rag, atol=1e-5, rtol=1e-5), "ragged mismatch"

    # 4) Ragged multi-block grid with an explicitly small tile — exercises the
    #    masked partial last block on a >1-step grid (no pad/slice round trip).
    x_mb = jax.random.normal(k3, (7, 8, 128), dtype=jnp.float32)  # rows=56
    w_mb = (1.0 + 0.05 * jax.random.normal(k2, (128,), dtype=jnp.float32))
    y_mb = jax.block_until_ready(lp_rms_norm(x_mb, w_mb, eps, block_rows=16))
    ref_mb = _reference(x_mb, w_mb, eps)
    assert jnp.allclose(y_mb, ref_mb, atol=1e-5, rtol=1e-5), "multi-block mismatch"

    print("KERNEL_OK")
</pallas_src>

<mosaic_0001>
module attributes {stable_mosaic.version = 11 : i64} {
  func.func @_lp_rms_norm_kernel(%arg0: i32, %arg1: memref<16x32xf32, #tpu.memory_space<vmem>>, %arg2: memref<1x32xf32, #tpu.memory_space<vmem>>, %arg3: memref<16x32xf32, #tpu.memory_space<vmem>>) attributes {dimension_semantics = [#tpu.dimension_semantics<parallel>], iteration_bounds = array<i64: 1>, scalar_prefetch = 0 : i64, scratch_operands = 0 : i64, tpu.core_type = #tpu.core_type<tc>, window_params = [{transform_indices = @transform_0, window_bounds = array<i64: 16, 32>}, {pipeline_mode = #tpu.pipeline_mode<synchronous>, transform_indices = @transform_1, window_bounds = array<i64: 1, 32>}, {transform_indices = @transform_2, window_bounds = array<i64: 16, 32>}]} {
    %c0 = arith.constant 0 : index
    %c0_0 = arith.constant 0 : index
    %0 = vector.load %arg1[%c0, %c0_0] : memref<16x32xf32, #tpu.memory_space<vmem>>, vector<16x32xf32>
    %1 = arith.mulf %0, %0 : vector<16x32xf32>
    %cst = arith.constant dense<0.000000e+00> : vector<16xf32>
    %2 = vector.multi_reduction <add>, %1, %cst [1] : vector<16x32xf32> to vector<16xf32>
    %3 = vector.shape_cast %2 : vector<16xf32> to vector<16x1xf32>
    %cst_1 = arith.constant 3.125000e-02 : f32
    %4 = vector.broadcast %cst_1 : f32 to vector<16x1xf32>
    %5 = arith.mulf %3, %4 : vector<16x1xf32>
    %cst_2 = arith.constant 9.99999974E-6 : f32
    %6 = vector.broadcast %cst_2 : f32 to vector<16x1xf32>
    %7 = arith.addf %5, %6 : vector<16x1xf32>
    %8 = math.rsqrt %7 : vector<16x1xf32>
    %9 = vector.broadcast %8 : vector<16x1xf32> to vector<16x32xf32>
    %10 = arith.mulf %0, %9 : vector<16x32xf32>
    %c0_3 = arith.constant 0 : index
    %c0_4 = arith.constant 0 : index
    %11 = vector.load %arg2[%c0_3, %c0_4] : memref<1x32xf32, #tpu.memory_space<vmem>>, vector<1x32xf32>
    %12 = vector.broadcast %11 : vector<1x32xf32> to vector<16x32xf32>
    %13 = arith.mulf %10, %12 : vector<16x32xf32>
    %c0_5 = arith.constant 0 : index
    %c0_6 = arith.constant 0 : index
    %14 = vector.load %arg3[%c0_5, %c0_6] : memref<16x32xf32, #tpu.memory_space<vmem>>, vector<16x32xf32>
    tpu.vector_store %arg3[%c0_5, %c0_6], %13 {strides = array<i32>} : memref<16x32xf32, #tpu.memory_space<vmem>>, vector<16x32xf32>,
    return
  }
  func.func @transform_0(%arg0: i32) -> (i32, i32) {
    %c0_i32 = arith.constant 0 : i32
    %c0_i32_0 = arith.constant 0 : i32
    return %arg0, %c0_i32 : i32, i32
  }
  func.func @transform_1(%arg0: i32) -> (i32, i32) {
    %c0_i32 = arith.constant 0 : i32
    %c0_i32_0 = arith.constant 0 : i32
    %c0_i32_1 = arith.constant 0 : i32
    return %c0_i32, %c0_i32_0 : i32, i32
  }
  func.func @transform_2(%arg0: i32) -> (i32, i32) {
    %c0_i32 = arith.constant 0 : i32
    %c0_i32_0 = arith.constant 0 : i32
    return %arg0, %c0_i32 : i32, i32
  }
}

</mosaic_0001>

<bundles_post_ra>
// kernel: tpu_custom_call.1
= control target key start
LH: loop header
LB: loop body
LE: loop exit
PB: predicated region body
PF: predicated region fallthrough
CT: control target
= control target key end

     0   :  { %7 = vsyncpa [#allocation3], 0  ;;  %s164_s0 = inlined_call_operand.hbm [shape: f32[16,32], index: 0, kind: input, shape index: {}]   ;;  %s165_s1 = inlined_call_operand.vmem [shape: f32[1,32], index: 1, kind: input, shape index: {}]   ;;  %s166_s2 = inlined_call_operand.hbm [shape: f32[16,32], index: 2, kind: output, shape index: {}]  }
   0x1   :  { %8 = vsyncpa [#allocation4], 0  ;;  %s126_s9 = smov [#allocation2]  }
   0x2   :  { %s14_s10 = sshll.u32 %s126_s9, 4  ;;  %s15_s10 = int_to_ptr.vmem [resolvable:$true] %s14_s10 }
   0x3   :  { %s90_s11 = scalar_lea.vmem %s15_s10, 256  ;;  %p95_p1 = scmp.lt.s32.totalorder %s15_s10, %s15_s10 }
   0x4   :  { %p91_p0 = scmp.ne.s32.totalorder %s15_s10, %s90_s11  ;;  %p96_p2 = scmp.lt.s32.totalorder %s90_s11, %s90_s11 }
   0x6   :  { %p97_p3 = por %p96_p2, %p95_p1 }
   0x8   :  { %p98_p4 = pnand %p97_p3, %p91_p0 }
   0xa   :  { %101 = shalt.err (!%p98_p4)
}
   0xb   :  { %s127_s12 = smov 128   ;;  %s128_s13 = smov 8  }
   0xc   :  { %20 = dma.hbm_to_vmem [thread:$0]  %s164_s0, 256, %s15_s10, [#allocation3], %s127_s12, %s127_s12, %s128_s13  }
   0xd   :  { %122 = dma.done.wait [#allocation3], 256  }
   0xe   :  { %123 = vsyncadd [#allocation3], 4294967040  ;;  %v26_v0 = vld [vmem:[#allocation2] sm:$0xff]  ;;  %vm30_vm0 = vcmask 261120   ;;  %v27_v1 = vld [vmem:[#allocation2 + $0x8] sm:$0xff]  ;;  %s129_s17 = smov [#allocation5]  }
   0xf   :  { %v28_v2 = vmul.f32 %v26_v0, %v26_v0  ;;  %v29_v3 = vmul.f32 %v27_v1, %v27_v1  ;;  %v73_v13 = vld [vmem:[%s165_s1] ss:$0 sm:$0xff]  ;;  %s61_s18 = sshll.u32 %s129_s17, 4  ;;  %s62_s18 = int_to_ptr.vmem [resolvable:$true] %s61_s18 }
  0x10   :  { %s102_s19 = scalar_lea.vmem %s62_s18, 256  ;;  %p107_p6 = scmp.lt.s32.totalorder %s62_s18, %s62_s18 }
  0x11   :  { %v31_v4 = vsel %vm30_vm0, %v28_v2, 0.0  ;;  %v34_v5 = vsel %vm30_vm0, %v29_v3, 0.0  ;;  %p103_p5 = scmp.ne.s32.totalorder %s62_s18, %s102_s19  ;;  %p108_p7 = scmp.lt.s32.totalorder %s102_s19, %s102_s19 }
  0x12   :  { %32 = vadd.xlane.f32.xlu0 %v31_v4 }
  0x13   :  { %p109_p8 = por %p108_p7, %p107_p6 }
  0x15   :  { %p110_p9 = pnand %p109_p8, %p103_p5 }
  0x16   :  { %35 = vadd.xlane.f32.xlu0 %v34_v5 }
  0x9b   :  { %v33_v6 = vpop.xlane.xlu0 %32 }
  0x9c   :  { %v37_v7 = vmul.f32 0.03125, %v33_v6 }
  0x9e   :  { %v39_v8 = vadd.f32 1e-05, %v37_v7 }
  0x9f   :  { %v36_v9 = vpop.xlane.xlu0 %35 }
  0xa0   :  { %78 = vrsqrt.f32 %v39_v8  ;;  %v38_v10 = vmul.f32 0.03125, %v36_v9 }
  0xa2   :  { %v40_v11 = vadd.f32 1e-05, %v38_v10 }
  0xa4   :  { %80 = vrsqrt.f32 %v40_v11 }
  0xad   :  { %v79_v12 = vpop.eup %78 }
  0xae   :  { %v43_v14 = vmul.f32 %v79_v12, %v26_v0 }
  0xb0   :  { %v52_v15 = vmul.f32 %v73_v13, %v43_v14 }
  0xb1   :  { %v81_v16 = vpop.eup %80 }
  0xb2   :  { %v44_v17 = vmul.f32 %v81_v16, %v27_v1  ;;  %54 = vst.msk [vmem:[#allocation5] sm:$0xff] %vm30_vm0, %v52_v15 }
  0xb4   :  { %v53_v18 = vmul.f32 %v73_v13, %v44_v17 }
  0xb6   :  { %55 = vst.msk [vmem:[#allocation5 + $0x8] sm:$0xff] %vm30_vm0, %v53_v18 }
  0xb7   :  { %113 = shalt.err (!%p110_p9)
}
  0xb8   :  { %67 = dma.vmem_to_hbm [thread:$0]  %s62_s18, 256, %s166_s2, [#allocation4], %s127_s12, %s127_s12, %s128_s13  }
  0xb9   :  { %124 = dma.done.wait [#allocation4], 256  }
  0xba   :  { %125 = vsyncadd [#allocation4], 4294967040 }
  0xbb   :  { %71 = vsyncpa [#allocation3], 1 }
  0xbc   :  { %72 = vsyncpa [#allocation4], 1 }

</bundles_post_ra>
